<compile_context>
chip_gen: v7x
topology: tpu7x:2x2x1
jax: 0.10.0
libtpu: 0.0.40
codegen_flags: <defaults>
</compile_context>

<pallas_src>
import functools

import jax
import jax.numpy as jnp
from jax.experimental import pallas as pl
from jax.experimental.pallas import tpu as pltpu


def _round_up(x: int, m: int) -> int:
    return ((x + m - 1) // m) * m


def _row_sum_kernel(x_ref, o_ref, acc_ref):
    """Accumulate f32 row sums of (bn, bd) input blocks across the D grid axis."""
    k = pl.program_id(1)

    @pl.when(k == 0)
    def _init():
        acc_ref[...] = jnp.zeros_like(acc_ref)

    # Accumulate in float32 regardless of input dtype (kernel is HBM-bound;
    # the VPU/XLU work here is free filler).
    acc_ref[...] += jnp.sum(x_ref[...].astype(jnp.float32), axis=1, keepdims=True)

    @pl.when(k == pl.num_programs(1) - 1)
    def _finalize():
        o_ref[...] = acc_ref[...]


@functools.partial(jax.jit, static_argnames=("bn_max", "bd_max"))
def toy_model_forward(x, *, bn_max=256, bd_max=4096):
    """x: (N, C, H, W) -> logits (N, 2): [:, 0] = sum(x), [:, 1] = -sum(x)."""
    n, c, h, w = x.shape
    d = c * h * w
    xf = x.reshape(n, d)

    # Block sizes: sublane-multiple rows, lane-multiple cols. 256 x 4096 f32
    # double-buffered is ~8 MiB -> under every generation's default scoped VMEM.
    bn = min(bn_max, _round_up(n, 8))
    bd = min(bd_max, _round_up(d, 128))

    # Zero-pad so the grid tiles the (N, D) slab exactly (sum-neutral padding).
    n_pad = _round_up(n, bn)
    d_pad = _round_up(d, bd)
    if (n_pad, d_pad) != (n, d):
        xf = jnp.pad(xf, ((0, n_pad - n), (0, d_pad - d)))

    grid = (n_pad // bn, d_pad // bd)
    itemsize = jnp.dtype(xf.dtype).itemsize

    sums = pl.pallas_call(
        _row_sum_kernel,
        out_shape=jax.ShapeDtypeStruct((n_pad, 1), jnp.float32),
        grid_spec=pltpu.PrefetchScalarGridSpec(
            num_scalar_prefetch=0,
            grid=grid,
            in_specs=[pl.BlockSpec((bn, bd), lambda i, k: (i, k))],
            out_specs=pl.BlockSpec((bn, 1), lambda i, k: (i, 0)),
            scratch_shapes=[pltpu.VMEM((bn, 1), jnp.float32)],
        ),
        compiler_params=pltpu.CompilerParams(
            dimension_semantics=("parallel", "arbitrary"),
        ),
        cost_estimate=pl.CostEstimate(
            flops=n_pad * d_pad,
            transcendentals=0,
            bytes_accessed=n_pad * d_pad * itemsize + n_pad * 4,
        ),
    )(xf)

    # Trivial [s, -s] assembly outside the kernel (matches ToyModel.forward).
    s = sums[:n, 0].astype(x.dtype)
    return jnp.stack((s, -s), axis=1)


def toy_model_reference(x):
    s = jnp.sum(x, axis=(1, 2, 3))
    return jnp.stack((s, -s), axis=1)


if __name__ == "__main__":
    key = jax.random.PRNGKey(0)
    k1, k2 = jax.random.split(key)

    # Shape from the original script: batch of 3-channel 2x2 images.
    x_small = jax.random.normal(k1, (2, 3, 2, 2), dtype=jnp.float32)
    out_small = jax.block_until_ready(toy_model_forward(x_small))
    ref_small = toy_model_reference(x_small)
    assert out_small.shape == (2, 2), out_small.shape
    assert jnp.allclose(out_small, ref_small, atol=1e-4, rtol=1e-5), (out_small, ref_small)

    # Larger case to exercise the multi-block reduction grid over D.
    x_big = jax.random.normal(k2, (8, 3, 64, 64), dtype=jnp.float32)
    out_big = jax.block_until_ready(toy_model_forward(x_big))
    ref_big = toy_model_reference(x_big)
    assert out_big.shape == (8, 2), out_big.shape
    assert jnp.allclose(out_big, ref_big, atol=1e-3, rtol=1e-5), (out_big, ref_big)

    print("KERNEL_OK")
</pallas_src>

<mosaic_0001>
module attributes {stable_mosaic.version = 11 : i64} {
  func.func @_row_sum_kernel(%arg0: i32, %arg1: i32, %arg2: memref<8x128xf32, #tpu.memory_space<vmem>>, %arg3: memref<8x1xf32, #tpu.memory_space<vmem>>, %arg4: memref<8x1xf32, #tpu.memory_space<vmem>>) attributes {dimension_semantics = [#tpu.dimension_semantics<parallel>, #tpu.dimension_semantics<arbitrary>], iteration_bounds = array<i64: 1, 1>, scalar_prefetch = 0 : i64, scratch_operands = 1 : i64, tpu.core_type = #tpu.core_type<tc>, window_params = [{transform_indices = @transform_0, window_bounds = array<i64: 8, 128>}, {transform_indices = @transform_1, window_bounds = array<i64: 8, 1>}]} {
    %c0_i32 = arith.constant 0 : i32
    %0 = arith.cmpi eq, %arg1, %c0_i32 : i32
    %1 = arith.extui %0 : i1 to i32
    %c0_i32_0 = arith.constant 0 : i32
    %2 = arith.cmpi ne, %1, %c0_i32_0 : i32
    scf.if %2 {
      %cst_8 = arith.constant 0.000000e+00 : f32
      %12 = vector.broadcast %cst_8 : f32 to vector<8x1xf32>
      %c0_9 = arith.constant 0 : index
      %c0_10 = arith.constant 0 : index
      %13 = vector.load %arg4[%c0_9, %c0_10] : memref<8x1xf32, #tpu.memory_space<vmem>>, vector<8x1xf32>
      tpu.vector_store %arg4[%c0_9, %c0_10], %12 {strides = array<i32>} : memref<8x1xf32, #tpu.memory_space<vmem>>, vector<8x1xf32>,
    } else {
    }
    %c0 = arith.constant 0 : index
    %c0_1 = arith.constant 0 : index
    %3 = vector.load %arg4[%c0, %c0_1] : memref<8x1xf32, #tpu.memory_space<vmem>>, vector<8x1xf32>
    %c0_2 = arith.constant 0 : index
    %c0_3 = arith.constant 0 : index
    %4 = vector.load %arg2[%c0_2, %c0_3] : memref<8x128xf32, #tpu.memory_space<vmem>>, vector<8x128xf32>
    %cst = arith.constant dense<0.000000e+00> : vector<8xf32>
    %5 = vector.multi_reduction <add>, %4, %cst [1] : vector<8x128xf32> to vector<8xf32>
    %6 = vector.shape_cast %5 : vector<8xf32> to vector<8x1xf32>
    %7 = arith.addf %3, %6 : vector<8x1xf32>
    %c0_4 = arith.constant 0 : index
    %c0_5 = arith.constant 0 : index
    %8 = vector.load %arg4[%c0_4, %c0_5] : memref<8x1xf32, #tpu.memory_space<vmem>>, vector<8x1xf32>
    tpu.vector_store %arg4[%c0_4, %c0_5], %7 {strides = array<i32>} : memref<8x1xf32, #tpu.memory_space<vmem>>, vector<8x1xf32>,
    %c0_i32_6 = arith.constant 0 : i32
    %9 = arith.cmpi eq, %arg1, %c0_i32_6 : i32
    %10 = arith.extui %9 : i1 to i32
    %c0_i32_7 = arith.constant 0 : i32
    %11 = arith.cmpi ne, %10, %c0_i32_7 : i32
    scf.if %11 {
      %c0_8 = arith.constant 0 : index
      %c0_9 = arith.constant 0 : index
      %12 = vector.load %arg4[%c0_8, %c0_9] : memref<8x1xf32, #tpu.memory_space<vmem>>, vector<8x1xf32>
      %c0_10 = arith.constant 0 : index
      %c0_11 = arith.constant 0 : index
      %13 = vector.load %arg3[%c0_10, %c0_11] : memref<8x1xf32, #tpu.memory_space<vmem>>, vector<8x1xf32>
      tpu.vector_store %arg3[%c0_10, %c0_11], %12 {strides = array<i32>} : memref<8x1xf32, #tpu.memory_space<vmem>>, vector<8x1xf32>,
    } else {
    }
    return
  }
  func.func @transform_0(%arg0: i32, %arg1: i32) -> (i32, i32) {
    %c0_i32 = arith.constant 0 : i32
    return %arg0, %arg1 : i32, i32
  }
  func.func @transform_1(%arg0: i32, %arg1: i32) -> (i32, i32) {
    %c0_i32 = arith.constant 0 : i32
    %c0_i32_0 = arith.constant 0 : i32
    return %arg0, %c0_i32 : i32, i32
  }
}

</mosaic_0001>

<bundles_post_ra>
// kernel: toy_model_forward.1
= control target key start
LH: loop header
LB: loop body
LE: loop exit
PB: predicated region body
PF: predicated region fallthrough
CT: control target
= control target key end

     0   :  { %vm12_vm0 = vcmask 7168   ;;  %v31_v1 = vmov 0.0   ;;  %s48_s0 = inlined_call_operand.vmem [shape: f32[8,128], index: 0, kind: input, shape index: {}]   ;;  %s49_s1 = inlined_call_operand.vmem [shape: f32[8,1], index: 1, kind: output, shape index: {}]  }
   0x1   :  { %v15_v0 = vld [vmem:[%s48_s0] sm:$0xff]  ;;  %13 = vst.msk [vmem:[#allocation2] sm:$0xff] %vm12_vm0, %v31_v1 }
   0x2   :  { %16 = vadd.xlane.f32.xlu0 %v15_v0 }
   0x8   :  { %v14_v2 = vld [vmem:[#allocation2] sm:$0xff] }
  0x8f   :  { %v17_v3 = vpop.xlane.xlu0 %16 }
  0x90   :  { %v18_v4 = vadd.f32 %v17_v3, %v14_v2 }
  0x92   :  { %20 = vst.msk [vmem:[#allocation2] sm:$0xff] %vm12_vm0, %v18_v4 }
  0x99   :  { %v24_v5 = vld [vmem:[#allocation2] sm:$0xff] }
  0x9a   :  { %25 = vst.msk [vmem:[%s49_s1] sm:$0xff] %vm12_vm0, %v24_v5 }

</bundles_post_ra>
